<compile_context>
chip_gen: v7x
topology: tpu7x:2x2x1
jax: 0.10.0
libtpu: 0.0.40
codegen_flags: <defaults>
</compile_context>

<pallas_src>
import jax
import jax.numpy as jnp
from jax.experimental import pallas as pl
from jax.experimental.pallas import tpu as pltpu

LANES = 128
SUBLANES = 8
MAX_BLOCK_ROWS = 1024  # (1024, 128) f32 block = 512 KiB; fits v5e/v6e/v7x VMEM


def _focal_kernel_factory(eps, gamma, positive_weight, n_valid, block_rows,
                          needs_mask):
    g_int = int(gamma)
    use_int_gamma = (float(gamma) == float(g_int)) and (0 <= g_int <= 8)

    def _ipow(x, k):
        # small integer power via repeated multiplies (VPU only, no EUP)
        if k == 0:
            return jnp.ones_like(x)
        r = x
        for _ in range(k - 1):
            r = r * x
        return r

    def kernel(t_ref, p_ref, o_ref):
        i = pl.program_id(0)

        # Output block doubles as the running (8, 128) vector accumulator.
        @pl.when(i == 0)
        def _():
            o_ref[...] = jnp.zeros_like(o_ref)

        p = jnp.clip(p_ref[...].astype(jnp.float32), eps, 1.0 - eps)
        t = t_ref[...].astype(jnp.float32)
        q = 1.0 - p
        logp = jnp.log(p)
        logq = jnp.log(q)

        if use_int_gamma:
            pow_q = _ipow(q, g_int)       # (1-p)^gamma
            pow_p = _ipow(p, g_int)       # p^gamma
        else:
            pow_q = jnp.exp(gamma * logq)  # reuse log(1-p)
            pow_p = jnp.exp(gamma * logp)  # reuse log(p)

        loss = -(positive_weight * pow_q * t * logp
                 + pow_p * (1.0 - t) * logq)

        if needs_mask:
            # Zero out padded / out-of-bounds elements (only the tail block
            # can contain them; the compare is cheap VPU work).
            row = jax.lax.broadcasted_iota(jnp.int32, loss.shape, 0)
            lane = jax.lax.broadcasted_iota(jnp.int32, loss.shape, 1)
            gidx = (i * block_rows + row) * LANES + lane
            loss = jnp.where(gidx < n_valid, loss, 0.0)

        # Fold block rows down to 8 sublanes (plain vreg adds) and accumulate.
        folded = jnp.sum(
            loss.reshape(block_rows // SUBLANES, SUBLANES, LANES), axis=0)
        o_ref[...] += folded

    return kernel


def focal_loss(targets, preds, *, eps=1e-8, gamma=2.0, positive_weight=1.0,
               reduction="mean"):
    """Focal loss matching the PyTorch module. Returns a scalar float32."""
    assert targets.shape == preds.shape

    t_flat = jnp.ravel(targets)
    p_flat = jnp.ravel(preds)
    n = t_flat.shape[0]

    # Pad only up to the next (8 * 128)-element boundary (<= 1023 elements).
    tile_elems = SUBLANES * LANES
    n_pad = pl.cdiv(n, tile_elems) * tile_elems
    if n_pad != n:
        t_flat = jnp.pad(t_flat, (0, n_pad - n))
        p_flat = jnp.pad(p_flat, (0, n_pad - n))

    rows = n_pad // LANES                      # multiple of 8
    block_rows = min(MAX_BLOCK_ROWS, rows)     # multiple of 8
    grid_size = pl.cdiv(rows, block_rows)
    # Mask needed iff the grid covers more elements than the valid count
    # (lane-level pad and/or a partial last block).
    needs_mask = (grid_size * block_rows * LANES) != n

    t2 = t_flat.reshape(rows, LANES)
    p2 = p_flat.reshape(rows, LANES)

    tile_spec = pl.BlockSpec((block_rows, LANES), lambda i: (i, 0))
    out_spec = pl.BlockSpec((SUBLANES, LANES), lambda i: (0, 0))

    kernel = _focal_kernel_factory(float(eps), float(gamma),
                                   float(positive_weight), n, block_rows,
                                   needs_mask)

    # TODO(synk): on v7x, split the grid as (2, chunks) with
    # ("parallel", "arbitrary") and per-core partial sums to use both TCs.
    partial = pl.pallas_call(
        kernel,
        out_shape=jax.ShapeDtypeStruct((SUBLANES, LANES), jnp.float32),
        grid_spec=pltpu.PrefetchScalarGridSpec(
            num_scalar_prefetch=0,
            grid=(grid_size,),
            in_specs=[tile_spec, tile_spec],
            out_specs=out_spec,
        ),
        compiler_params=pltpu.CompilerParams(
            dimension_semantics=("arbitrary",)),
    )(t2, p2)

    loss = jnp.sum(partial)  # tiny (8, 128) final reduce in the wrapper
    # reduction == 'mean' takes the mean of a scalar -> identical to 'sum'
    return loss


def _reference(targets, preds, eps=1e-8, gamma=2.0, positive_weight=1.0):
    preds = jnp.clip(preds, eps, 1 - eps)
    loss = -(positive_weight * jnp.power(1 - preds, gamma) * targets
             * jnp.log(preds)
             + jnp.power(preds, gamma) * (1 - targets) * jnp.log(1 - preds))
    return jnp.sum(loss)


if __name__ == "__main__":
    key = jax.random.PRNGKey(0)
    k1, k2 = jax.random.split(key)

    # NCHW inputs, small shapes
    shape = (2, 4, 16, 16)
    preds = jax.random.uniform(k1, shape, dtype=jnp.float32,
                               minval=0.0, maxval=1.0)
    targets = (jax.random.uniform(k2, shape, dtype=jnp.float32)
               > 0.5).astype(jnp.float32)

    out = focal_loss(targets, preds)
    out = jax.block_until_ready(out)

    ref = _reference(targets, preds)
    assert jnp.allclose(out, ref, rtol=1e-5, atol=1e-3), (out, ref)

    # also exercise a ragged size (forces the in-kernel iota mask path)
    n_odd = 5000
    p_odd = jax.random.uniform(k1, (n_odd,), dtype=jnp.float32)
    t_odd = (jax.random.uniform(k2, (n_odd,), dtype=jnp.float32)
             > 0.5).astype(jnp.float32)
    out2 = jax.block_until_ready(focal_loss(t_odd, p_odd))
    ref2 = _reference(t_odd, p_odd)
    assert jnp.allclose(out2, ref2, rtol=1e-5, atol=1e-3), (out2, ref2)

    print("KERNEL_OK")
</pallas_src>

<mosaic_0001>
module attributes {stable_mosaic.version = 11 : i64} {
  func.func @kernel(%arg0: i32, %arg1: memref<16x128xf32, #tpu.memory_space<vmem>>, %arg2: memref<16x128xf32, #tpu.memory_space<vmem>>, %arg3: memref<8x128xf32, #tpu.memory_space<vmem>>) attributes {dimension_semantics = [#tpu.dimension_semantics<arbitrary>], iteration_bounds = array<i64: 1>, scalar_prefetch = 0 : i64, scratch_operands = 0 : i64, tpu.core_type = #tpu.core_type<tc>, window_params = [{transform_indices = @transform_0, window_bounds = array<i64: 16, 128>}, {transform_indices = @transform_1, window_bounds = array<i64: 16, 128>}, {pipeline_mode = #tpu.pipeline_mode<synchronous>, transform_indices = @transform_2, window_bounds = array<i64: 8, 128>}]} {
    %c0_i32 = arith.constant 0 : i32
    %0 = arith.cmpi eq, %arg0, %c0_i32 : i32
    %1 = arith.extui %0 : i1 to i32
    %c0_i32_0 = arith.constant 0 : i32
    %2 = arith.cmpi ne, %1, %c0_i32_0 : i32
    scf.if %2 {
      %cst_14 = arith.constant 0.000000e+00 : f32
      %31 = vector.broadcast %cst_14 : f32 to vector<8x128xf32>
      %c0_15 = arith.constant 0 : index
      %c0_16 = arith.constant 0 : index
      %32 = vector.load %arg3[%c0_15, %c0_16] : memref<8x128xf32, #tpu.memory_space<vmem>>, vector<8x128xf32>
      tpu.vector_store %arg3[%c0_15, %c0_16], %31 {strides = array<i32>} : memref<8x128xf32, #tpu.memory_space<vmem>>, vector<8x128xf32>,
    } else {
    }
    %c0 = arith.constant 0 : index
    %c0_1 = arith.constant 0 : index
    %3 = vector.load %arg2[%c0, %c0_1] : memref<16x128xf32, #tpu.memory_space<vmem>>, vector<16x128xf32>
    %cst = arith.constant 9.99999993E-9 : f32
    %cst_2 = arith.constant 1.000000e+00 : f32
    %4 = vector.broadcast %cst : f32 to vector<16x128xf32>
    %5 = arith.maximumf %4, %3 : vector<16x128xf32>
    %6 = vector.broadcast %cst_2 : f32 to vector<16x128xf32>
    %7 = arith.minimumf %6, %5 : vector<16x128xf32>
    %c0_3 = arith.constant 0 : index
    %c0_4 = arith.constant 0 : index
    %8 = vector.load %arg1[%c0_3, %c0_4] : memref<16x128xf32, #tpu.memory_space<vmem>>, vector<16x128xf32>
    %cst_5 = arith.constant 1.000000e+00 : f32
    %9 = vector.broadcast %cst_5 : f32 to vector<16x128xf32>
    %10 = arith.subf %9, %7 : vector<16x128xf32>
    %11 = math.log %7 : vector<16x128xf32>
    %12 = math.log %10 : vector<16x128xf32>
    %13 = arith.mulf %10, %10 : vector<16x128xf32>
    %14 = arith.mulf %7, %7 : vector<16x128xf32>
    %cst_6 = arith.constant 1.000000e+00 : f32
    %15 = vector.broadcast %cst_6 : f32 to vector<16x128xf32>
    %16 = arith.mulf %15, %13 : vector<16x128xf32>
    %17 = arith.mulf %16, %8 : vector<16x128xf32>
    %18 = arith.mulf %17, %11 : vector<16x128xf32>
    %cst_7 = arith.constant 1.000000e+00 : f32
    %19 = vector.broadcast %cst_7 : f32 to vector<16x128xf32>
    %20 = arith.subf %19, %8 : vector<16x128xf32>
    %21 = arith.mulf %14, %20 : vector<16x128xf32>
    %22 = arith.mulf %21, %12 : vector<16x128xf32>
    %23 = arith.addf %18, %22 : vector<16x128xf32>
    %cst_8 = arith.constant 0.000000e+00 : f32
    %24 = vector.broadcast %cst_8 : f32 to vector<16x128xf32>
    %25 = arith.subf %24, %23 : vector<16x128xf32>
    %26 = vector.shape_cast %25 : vector<16x128xf32> to vector<2x8x128xf32>
    %cst_9 = arith.constant dense<0.000000e+00> : vector<8x128xf32>
    %27 = vector.multi_reduction <add>, %26, %cst_9 [0] : vector<2x8x128xf32> to vector<8x128xf32>
    %c0_10 = arith.constant 0 : index
    %c0_11 = arith.constant 0 : index
    %28 = vector.load %arg3[%c0_10, %c0_11] : memref<8x128xf32, #tpu.memory_space<vmem>>, vector<8x128xf32>
    %29 = arith.addf %28, %27 : vector<8x128xf32>
    %c0_12 = arith.constant 0 : index
    %c0_13 = arith.constant 0 : index
    %30 = vector.load %arg3[%c0_12, %c0_13] : memref<8x128xf32, #tpu.memory_space<vmem>>, vector<8x128xf32>
    tpu.vector_store %arg3[%c0_12, %c0_13], %29 {strides = array<i32>} : memref<8x128xf32, #tpu.memory_space<vmem>>, vector<8x128xf32>,
    return
  }
  func.func @transform_0(%arg0: i32) -> (i32, i32) {
    %c0_i32 = arith.constant 0 : i32
    %c0_i32_0 = arith.constant 0 : i32
    return %arg0, %c0_i32 : i32, i32
  }
  func.func @transform_1(%arg0: i32) -> (i32, i32) {
    %c0_i32 = arith.constant 0 : i32
    %c0_i32_0 = arith.constant 0 : i32
    return %arg0, %c0_i32 : i32, i32
  }
  func.func @transform_2(%arg0: i32) -> (i32, i32) {
    %c0_i32 = arith.constant 0 : i32
    %c0_i32_0 = arith.constant 0 : i32
    %c0_i32_1 = arith.constant 0 : i32
    return %c0_i32, %c0_i32_0 : i32, i32
  }
}

</mosaic_0001>

<bundles_post_ra>
// kernel: tpu_custom_call.1
= control target key start
LH: loop header
LB: loop body
LE: loop exit
PB: predicated region body
PF: predicated region fallthrough
CT: control target
= control target key end

     0   :  { %7 = vsyncpa [#allocation3], 0  ;;  %s243_s0 = inlined_call_operand.hbm [shape: f32[16,128], index: 0, kind: input, shape index: {}]   ;;  %s244_s1 = inlined_call_operand.hbm [shape: f32[16,128], index: 1, kind: input, shape index: {}]   ;;  %s245_s2 = inlined_call_operand.hbm [shape: f32[8,128], index: 2, kind: output, shape index: {}]  }
   0x1   :  { %8 = vsyncpa [#allocation6], 0 }
   0x2   :  { %9 = vsyncpa [#allocation4], 0  ;;  %s187_s9 = smov [#allocation2]   ;;  %s115_s13 = scalar_lea.hbm %s243_s0, 256 }
   0x3   :  { %s15_s10 = sshll.u32 %s187_s9, 4  ;;  %p116_p0 = scmp.ne.s32.totalorder %s243_s0, %s115_s13  ;;  %s16_s10 = int_to_ptr.vmem [resolvable:$true] %s15_s10 }
   0x4   :  { %p119_p1 = scmp.lt.u32.totalorder %s115_s13, %s243_s0 }
   0x6   :  { %p121_p2 = pnand %p119_p1, %p116_p0 }
   0x8   :  { %124 = shalt.err (!%p121_p2)
}
   0x9   :  { %s125_s18 = scalar_lea.vmem %s16_s10, 256  ;;  %p130_p4 = scmp.lt.s32.totalorder %s16_s10, %s16_s10 }
   0xa   :  { %p126_p3 = scmp.ne.s32.totalorder %s16_s10, %s125_s18  ;;  %p131_p5 = scmp.lt.s32.totalorder %s125_s18, %s125_s18 }
   0xc   :  { %p132_p6 = por %p131_p5, %p130_p4 }
   0xe   :  { %p133_p7 = pnand %p132_p6, %p126_p3 }
  0x10   :  { %136 = shalt.err (!%p133_p7)
}
  0x11   :  { %s188_s19 = smov 128   ;;  %s189_s20 = smov 8  }
  0x12   :  { %21 = dma.hbm_to_vmem [thread:$0]  %s243_s0, 256, %s16_s10, [#allocation3], %s188_s19, %s188_s19, %s189_s20  }
  0x13   :  { %s190_s23 = smov [#allocation5]   ;;  %s137_s27 = scalar_lea.hbm %s244_s1, 256 }
  0x14   :  { %s27_s24 = sshll.u32 %s190_s23, 4  ;;  %p138_p8 = scmp.ne.s32.totalorder %s244_s1, %s137_s27  ;;  %s28_s24 = int_to_ptr.vmem [resolvable:$true] %s27_s24 }
  0x15   :  { %p141_p9 = scmp.lt.u32.totalorder %s137_s27, %s244_s1 }
  0x17   :  { %p143_p10 = pnand %p141_p9, %p138_p8 }
  0x19   :  { %146 = shalt.err (!%p143_p10)
}
  0x1a   :  { %s147_s4 = scalar_lea.vmem %s28_s24, 256  ;;  %p152_p12 = scmp.lt.s32.totalorder %s28_s24, %s28_s24 }
  0x1b   :  { %p148_p11 = scmp.ne.s32.totalorder %s28_s24, %s147_s4  ;;  %p153_p13 = scmp.lt.s32.totalorder %s147_s4, %s147_s4 }
  0x1d   :  { %p154_p0 = por %p153_p13, %p152_p12 }
  0x1f   :  { %p155_p1 = pnand %p154_p0, %p148_p11 }
  0x21   :  { %158 = shalt.err (!%p155_p1)
}
  0x22   :  { %33 = dma.hbm_to_vmem [thread:$0]  %s244_s1, 256, %s28_s24, [#allocation6], %s188_s19, %s188_s19, %s189_s20  }
  0x23   :  { %181 = dma.done.wait [#allocation3], 256  }
  0x24   :  { %182 = vsyncadd [#allocation3], 4294967040 }
  0x25   :  { %183 = dma.done.wait [#allocation6], 256  }
  0x26   :  { %184 = vsyncadd [#allocation6], 4294967040  ;;  %v45_v0 = vld [vmem:[#allocation5] sm:$0xff]  ;;  %v46_v1 = vld [vmem:[#allocation5 + $0x8] sm:$0xff]  ;;  %s191_s1 = smov [#allocation7]  }
  0x27   :  { %v47_v2 = vmax.f32 %v45_v0, 1e-08  ;;  %v48_v3 = vmax.f32 %v46_v1, 1e-08  ;;  %v51_v8 = vld [vmem:[#allocation2] sm:$0xff]  ;;  %v52_v9 = vld [vmem:[#allocation2 + $0x8] sm:$0xff] }
  0x28   :  { %v71_v13 = vsub.f32 1.0, %v51_v8  ;;  %v72_v15 = vsub.f32 1.0, %v52_v9  ;;  %s91_s6 = sshll.u32 %s191_s1, 4  ;;  %s92_s6 = int_to_ptr.vmem [resolvable:$true] %s91_s6 }
  0x29   :  { %v49_v4 = vmin.f32 %v47_v2, 1.0  ;;  %v50_v5 = vmin.f32 %v48_v3, 1.0  ;;  %s159_s7 = scalar_lea.vmem %s92_s6, 128  ;;  %p164_p3 = scmp.lt.s32.totalorder %s92_s6, %s92_s6 }
  0x2a   :  { %p160_p2 = scmp.ne.s32.totalorder %s92_s6, %s159_s7  ;;  %p165_p4 = scmp.lt.s32.totalorder %s159_s7, %s159_s7 }
  0x2b   :  { %v53_v6 = vsub.f32 1.0, %v49_v4  ;;  %v54_v7 = vsub.f32 1.0, %v50_v5  ;;  %107 = vlog2.f32 %v49_v4  ;;  %v65_v12 = vmul.f32 %v49_v4, %v49_v4 }
  0x2c   :  { %109 = vlog2.f32 %v50_v5  ;;  %v66_v14 = vmul.f32 %v50_v5, %v50_v5  ;;  %p166_p5 = por %p165_p4, %p164_p3 }
  0x2d   :  { %111 = vlog2.f32 %v53_v6  ;;  %v63_v10 = vmul.f32 %v53_v6, %v53_v6  ;;  %v64_v11 = vmul.f32 %v54_v7, %v54_v7  ;;  %v73_v21 = vmul.f32 %v71_v13, %v65_v12 }
  0x2e   :  { %113 = vlog2.f32 %v54_v7  ;;  %v74_v24 = vmul.f32 %v72_v15, %v66_v14  ;;  %p167_p6 = pnand %p166_p5, %p160_p2 }
  0x2f   :  { %v67_v16 = vmul.f32 %v63_v10, %v51_v8  ;;  %v68_v18 = vmul.f32 %v64_v11, %v52_v9 }
  0x35   :  { %v108_v17 = vpop.eup %107 }
  0x36   :  { %v110_v19 = vpop.eup %109  ;;  %v56_v20 = vmul.f32 0.6931472, %v108_v17 }
  0x37   :  { %v112_v22 = vpop.eup %111  ;;  %v58_v23 = vmul.f32 0.6931472, %v110_v19 }
  0x38   :  { %v114_v25 = vpop.eup %113  ;;  %v60_v26 = vmul.f32 0.6931472, %v112_v22  ;;  %v69_v27 = vmul.f32 %v67_v16, %v56_v20 }
  0x39   :  { %v62_v28 = vmul.f32 0.6931472, %v114_v25  ;;  %v70_v29 = vmul.f32 %v68_v18, %v58_v23 }
  0x3a   :  { %v75_v30 = vmul.f32 %v73_v21, %v60_v26 }
  0x3b   :  { %v76_v31 = vmul.f32 %v74_v24, %v62_v28 }
  0x3c   :  { %v77_v32 = vadd.f32 %v75_v30, %v69_v27 }
  0x3d   :  { %v78_v33 = vadd.f32 %v76_v31, %v70_v29 }
  0x3e   :  { %v79_v34 = vsub.f32 0.0, %v77_v32 }
  0x3f   :  { %v80_v35 = vsub.f32 0.0, %v78_v33 }
  0x41   :  { %v81_v36 = vadd.f32 %v80_v35, %v79_v34 }
  0x43   :  { %84 = vst [vmem:[#allocation7] sm:$0xff] %v81_v36 }
  0x44   :  { %170 = shalt.err (!%p167_p6)
}
  0x45   :  { %s171_s10 = scalar_lea.hbm %s245_s2, 128 }
  0x46   :  { %p172_p7 = scmp.ne.s32.totalorder %s245_s2, %s171_s10  ;;  %p175_p8 = scmp.lt.u32.totalorder %s171_s10, %s245_s2 }
  0x48   :  { %p177_p9 = pnand %p175_p8, %p172_p7 }
  0x4a   :  { %180 = shalt.err (!%p177_p9)
}
  0x4b   :  { %94 = dma.vmem_to_hbm [thread:$0]  %s92_s6, 128, %s245_s2, [#allocation4]  }
  0x4c   :  { %185 = dma.done.wait [#allocation4], 128  }
  0x4d   :  { %186 = vsyncadd [#allocation4], 4294967168 }
  0x4e   :  { %98 = vsyncpa [#allocation3], 1 }
  0x4f   :  { %99 = vsyncpa [#allocation6], 1 }
  0x50   :  { %100 = vsyncpa [#allocation4], 1 }

</bundles_post_ra>
